<compile_context>
chip_gen: v7x
topology: tpu7x:2x2x1
jax: 0.10.0
libtpu: 0.0.40
codegen_flags: <defaults>
</compile_context>

<pallas_src>
import jax
import jax.numpy as jnp
from jax.experimental import pallas as pl
from jax.experimental.pallas import tpu as pltpu


def _pa_body(qh_ref, x_ref, wx_ref, bx_ref, o_ref, m=None):
    tb, n, d = x_ref.shape
    h = wx_ref.shape[1]

    x = x_ref[...]                                                # (TB, N, D) in x dtype

    # One MXU matmul for the whole batch tile: (TB*N, D) @ (D, H) -> f32 acc.
    xa = jnp.tanh(
        jnp.dot(x.reshape(tb * n, d), wx_ref[...],
                preferred_element_type=jnp.float32)
        + bx_ref[...]
    ).reshape(tb, n, h)                                           # (TB, N, H) f32

    qh = qh_ref[...]                                              # (TB, H) f32

    # Attention logits / weights, lane-dense (TB, N).
    scores = jnp.sum(xa * qh[:, None, :], axis=-1)                # (TB, N) f32
    a = jnp.exp(scores)                                           # faithful to torch ref (no max-sub)
    if m is not None:
        a = a * m                                                 # (TB, N)

    denom = jnp.sum(a, axis=-1, keepdims=True) + 1e-8             # (TB, 1)
    a = a * (1.0 / denom)                                         # exact divide on tiny (TB, 1)

    # Weighted average over N: multiply in x's dtype, accumulate in f32, so no
    # full-size f32 copy of the x tile is materialized when x is bf16.
    prod = a.astype(x.dtype)[:, :, None] * x                      # (TB, N, D) in x dtype
    out = jnp.sum(prod, axis=1, dtype=jnp.float32)                # (TB, D) f32
    o_ref[...] = out.astype(o_ref.dtype)


def _pa_kernel_nomask(qh_ref, x_ref, wx_ref, bx_ref, o_ref):
    _pa_body(qh_ref, x_ref, wx_ref, bx_ref, o_ref, m=None)


def _pa_kernel_masked(qh_ref, x_ref, m_ref, wx_ref, bx_ref, o_ref):
    _pa_body(qh_ref, x_ref, wx_ref, bx_ref, o_ref, m=m_ref[...])


def _round_up(a, b):
    return ((a + b - 1) // b) * b


def _vmem_capacity_bytes():
    try:
        return int(pltpu.get_tpu_info().vmem_capacity_bytes)
    except Exception:
        return 64 << 20          # conservative (v7x-class) fallback


def personalized_attention(q, x, wx, bx, wq, bq, m=None, *, block_b=None):
    """q: (B,1,Dq), x: (B,N,D), m: (B,N,1) or None.
    wx: (D,H), bx: (H,), wq: (Dq,H), bq: (H,). Returns (B,1,D) in x.dtype."""
    B, N, D = x.shape
    H = wx.shape[1]
    out_dtype = x.dtype
    x_isz = x.dtype.itemsize

    # Hoist the 1-row-per-batch query projection: one dense (B,Dq)@(Dq,H) XLA
    # matmul instead of B tiny padded MXU pushes inside the kernel.
    qh = (jnp.einsum("bd,dh->bh", q[:, 0, :], wq) + bq).astype(jnp.float32)

    # x stays in its native dtype; the x-projection weight follows it so the
    # MXU runs bf16 x bf16 -> f32 when the caller feeds bf16 activations.
    wx_k = wx.astype(x.dtype)
    bx_k = bx.reshape(1, H).astype(jnp.float32)

    # --- generation-aware tile / VMEM budgets --------------------------------
    vmem_cap = _vmem_capacity_bytes()
    small_vmem = vmem_cap <= (64 << 20)     # v7x-class: 64 MiB VMEM/TC, 2 TCs/chip
    vmem_limit = (32 << 20) if small_vmem else (64 << 20)

    if block_b is None:
        # Per-grid-step VMEM working-set budget (leaves ~1/3 of the scoped
        # limit for Mosaic internal scratch / pipelining slack).
        budget = (20 << 20) if small_vmem else (40 << 20)
        # Bytes per batch element per grid step:
        #   2x double-buffered x block + 1 x-sized temp (reshape / weighted-sum
        #   product in x dtype) + f32 xa + possible f32 reduce temp + f32
        #   score/weight/mask rows + qh/output blocks.
        per_b = (3 * N * D * x_isz) + (4 * N * (H + D)) + (16 * N) + (8 * H) + (8 * D)
        tb = max(1, budget // per_b)
        if small_vmem and B >= 16:
            # v7x has 2 TensorCores: keep >= 2 grid steps so the "parallel"
            # batch axis can be split across both cores.
            tb = min(tb, B // 2)
        if tb >= B:
            block_b = B
        else:
            block_b = max(8, (tb // 8) * 8)   # multiple of 8 sublanes

    Bp = _round_up(B, block_b)
    if Bp != B:                               # pad batch; padded rows -> zeros, sliced off
        pad = Bp - B
        x = jnp.pad(x, ((0, pad), (0, 0), (0, 0)))
        qh = jnp.pad(qh, ((0, pad), (0, 0)))
        if m is not None:
            m = jnp.pad(m, ((0, pad), (0, 0), (0, 0)))

    grid = (Bp // block_b,)

    qh_spec = pl.BlockSpec((block_b, H), lambda b: (b, 0))
    x_spec = pl.BlockSpec((block_b, N, D), lambda b: (b, 0, 0))
    out_spec = pl.BlockSpec((block_b, D), lambda b: (b, 0))
    weight_specs = [
        pl.BlockSpec((D, H), lambda b: (0, 0)),      # wx (grid-constant)
        pl.BlockSpec((1, H), lambda b: (0, 0)),      # bx (grid-constant)
    ]

    if m is None:
        kernel = _pa_kernel_nomask
        in_specs = [qh_spec, x_spec] + weight_specs
        operands = (qh, x, wx_k, bx_k)
    else:
        kernel = _pa_kernel_masked
        m_lane = m[:, :, 0].astype(jnp.float32)      # lane-dense (Bp, N)
        in_specs = [qh_spec, x_spec,
                    pl.BlockSpec((block_b, N), lambda b: (b, 0))] + weight_specs
        operands = (qh, x, m_lane, wx_k, bx_k)

    cost = pl.CostEstimate(
        flops=2 * Bp * N * D * H + Bp * N * (2 * H + 2 * D + 4),
        transcendentals=Bp * N * (H + 1),
        bytes_accessed=(Bp * N * D * x_isz + Bp * D * x_isz
                        + 4 * Bp * (H + N) + 4 * D * H + 4 * H),
    )

    out = pl.pallas_call(
        kernel,
        out_shape=jax.ShapeDtypeStruct((Bp, D), out_dtype),
        grid_spec=pltpu.PrefetchScalarGridSpec(
            num_scalar_prefetch=0,
            grid=grid,
            in_specs=in_specs,
            out_specs=out_spec,
        ),
        compiler_params=pltpu.CompilerParams(
            dimension_semantics=("parallel",),       # batch axis shards across TCs
            vmem_limit_bytes=vmem_limit,
        ),
        cost_estimate=cost,
    )(*operands)

    return out[:B].reshape(B, 1, D)


def personalized_attention_ref(q, x, wx, bx, wq, bq, m=None):
    """Pure-JAX reference mirroring the PyTorch forward."""
    xa = jnp.tanh(jnp.einsum("bnd,dh->bnh", x, wx) + bx)           # (B,N,H)
    qh = jnp.einsum("bqd,dh->bqh", q, wq) + bq                     # (B,1,H)
    a = jnp.exp(jnp.sum(xa * qh, axis=-1, keepdims=True))          # (B,N,1)
    if m is not None:
        a = a * m
    a = a / (jnp.sum(a, axis=1, keepdims=True) + 1e-08)
    return jnp.einsum("bn1,bnd->b1d", a, x)


if __name__ == "__main__":
    key = jax.random.PRNGKey(0)

    B, N = 2, 8
    in_features = 32        # D (x feature dim)
    query_features = 16     # Dq (q feature dim)
    hidden_features = 32    # H

    k_q, k_x, k_m, k_wx, k_bx, k_wq, k_bq = jax.random.split(key, 7)

    q = jax.random.normal(k_q, (B, 1, query_features), dtype=jnp.float32)
    x = jax.random.normal(k_x, (B, N, in_features), dtype=jnp.float32)
    m = (jax.random.uniform(k_m, (B, N, 1)) > 0.2).astype(jnp.float32)

    # Deterministic "Linear"-style init (weights pre-transposed to (in, out)).
    lim_x = 1.0 / (in_features ** 0.5)
    lim_q = 1.0 / (query_features ** 0.5)
    wx = jax.random.uniform(k_wx, (in_features, hidden_features),
                            minval=-lim_x, maxval=lim_x, dtype=jnp.float32)
    bx = jax.random.uniform(k_bx, (hidden_features,),
                            minval=-lim_x, maxval=lim_x, dtype=jnp.float32)
    wq = jax.random.uniform(k_wq, (query_features, hidden_features),
                            minval=-lim_q, maxval=lim_q, dtype=jnp.float32)
    bq = jax.random.uniform(k_bq, (hidden_features,),
                            minval=-lim_q, maxval=lim_q, dtype=jnp.float32)

    # --- small f32 case, masked + unmasked (auto tile selection) -------------
    out_m = jax.block_until_ready(personalized_attention(q, x, wx, bx, wq, bq, m=m))
    out_nm = jax.block_until_ready(personalized_attention(q, x, wx, bx, wq, bq))

    ref_m = personalized_attention_ref(q, x, wx, bx, wq, bq, m=m)
    ref_nm = personalized_attention_ref(q, x, wx, bx, wq, bq)

    assert out_m.shape == (B, 1, in_features)
    assert jnp.allclose(out_m, ref_m, rtol=1e-4, atol=1e-4)
    assert jnp.allclose(out_nm, ref_nm, rtol=1e-4, atol=1e-4)

    # --- multi-step grid + batch-padding path (explicit block_b override) ----
    B2, N2 = 20, 16
    kq2, kx2, km2 = jax.random.split(jax.random.PRNGKey(1), 3)
    q2 = jax.random.normal(kq2, (B2, 1, query_features), dtype=jnp.float32)
    x2 = jax.random.normal(kx2, (B2, N2, in_features), dtype=jnp.float32)
    m2 = (jax.random.uniform(km2, (B2, N2, 1)) > 0.3).astype(jnp.float32)

    out2 = jax.block_until_ready(
        personalized_attention(q2, x2, wx, bx, wq, bq, m=m2, block_b=8))
    ref2 = personalized_attention_ref(q2, x2, wx, bx, wq, bq, m=m2)
    assert out2.shape == (B2, 1, in_features)
    assert jnp.allclose(out2, ref2, rtol=1e-4, atol=1e-4)

    # --- bf16 activations: x stays bf16 end-to-end, f32 accumulation ---------
    x2_bf = x2.astype(jnp.bfloat16)
    out_bf = jax.block_until_ready(
        personalized_attention(q2, x2_bf, wx, bx, wq, bq, m=m2))
    ref_bf = personalized_attention_ref(
        q2, x2_bf.astype(jnp.float32),
        wx.astype(jnp.bfloat16).astype(jnp.float32), bx, wq, bq, m=m2)
    assert out_bf.dtype == jnp.bfloat16
    assert out_bf.shape == (B2, 1, in_features)
    assert jnp.allclose(out_bf.astype(jnp.float32), ref_bf, rtol=3e-2, atol=3e-2)

    print("KERNEL_OK")
</pallas_src>

<mosaic_0001>
module attributes {stable_mosaic.version = 11 : i64} {
  func.func @_pa_kernel_masked(%arg0: i32, %arg1: memref<2x32xf32, #tpu.memory_space<vmem>>, %arg2: memref<2x8x32xf32, #tpu.memory_space<vmem>>, %arg3: memref<2x8xf32, #tpu.memory_space<vmem>>, %arg4: memref<32x32xf32, #tpu.memory_space<vmem>>, %arg5: memref<1x32xf32, #tpu.memory_space<vmem>>, %arg6: memref<2x32xf32, #tpu.memory_space<vmem>>) attributes {dimension_semantics = [#tpu.dimension_semantics<parallel>], iteration_bounds = array<i64: 1>, scalar_prefetch = 0 : i64, scratch_operands = 0 : i64, tpu.core_type = #tpu.core_type<tc>, window_params = [{transform_indices = @transform_0, window_bounds = array<i64: 2, 32>}, {transform_indices = @transform_1, window_bounds = array<i64: 2, 8, 32>}, {transform_indices = @transform_2, window_bounds = array<i64: 2, 8>}, {pipeline_mode = #tpu.pipeline_mode<synchronous>, transform_indices = @transform_3, window_bounds = array<i64: 32, 32>}, {pipeline_mode = #tpu.pipeline_mode<synchronous>, transform_indices = @transform_4, window_bounds = array<i64: 1, 32>}, {transform_indices = @transform_5, window_bounds = array<i64: 2, 32>}]} {
    %c0 = arith.constant 0 : index
    %c0_0 = arith.constant 0 : index
    %0 = vector.load %arg3[%c0, %c0_0] : memref<2x8xf32, #tpu.memory_space<vmem>>, vector<2x8xf32>
    %c0_1 = arith.constant 0 : index
    %c0_2 = arith.constant 0 : index
    %c0_3 = arith.constant 0 : index
    %1 = vector.load %arg2[%c0_1, %c0_2, %c0_3] : memref<2x8x32xf32, #tpu.memory_space<vmem>>, vector<2x8x32xf32>
    %2 = vector.shape_cast %1 : vector<2x8x32xf32> to vector<16x32xf32>
    %c0_4 = arith.constant 0 : index
    %c0_5 = arith.constant 0 : index
    %3 = vector.load %arg4[%c0_4, %c0_5] : memref<32x32xf32, #tpu.memory_space<vmem>>, vector<32x32xf32>
    %cst = arith.constant dense<0.000000e+00> : vector<16x32xf32>
    %4 = tpu.matmul %2, %3, %cst {dimension_numbers = #tpu.dot_dimension_numbers<[1], [0], [0], [1], [0, 0, 1, 1], [], []>} : vector<16x32xf32>, vector<32x32xf32>, vector<16x32xf32> -> vector<16x32xf32>
    %c0_6 = arith.constant 0 : index
    %c0_7 = arith.constant 0 : index
    %5 = vector.load %arg5[%c0_6, %c0_7] : memref<1x32xf32, #tpu.memory_space<vmem>>, vector<1x32xf32>
    %6 = vector.broadcast %5 : vector<1x32xf32> to vector<16x32xf32>
    %7 = arith.addf %4, %6 : vector<16x32xf32>
    %8 = math.tanh %7 : vector<16x32xf32>
    %9 = vector.shape_cast %8 : vector<16x32xf32> to vector<2x8x32xf32>
    %c0_8 = arith.constant 0 : index
    %c0_9 = arith.constant 0 : index
    %10 = vector.load %arg1[%c0_8, %c0_9] : memref<2x32xf32, #tpu.memory_space<vmem>>, vector<2x32xf32>
    %11 = vector.shape_cast %10 : vector<2x32xf32> to vector<2x1x32xf32>
    %12 = vector.broadcast %11 : vector<2x1x32xf32> to vector<2x8x32xf32>
    %13 = arith.mulf %9, %12 : vector<2x8x32xf32>
    %cst_10 = arith.constant dense<0.000000e+00> : vector<2x8xf32>
    %14 = vector.multi_reduction <add>, %13, %cst_10 [2] : vector<2x8x32xf32> to vector<2x8xf32>
    %15 = math.exp %14 : vector<2x8xf32>
    %16 = arith.mulf %15, %0 : vector<2x8xf32>
    %cst_11 = arith.constant dense<0.000000e+00> : vector<2xf32>
    %17 = vector.multi_reduction <add>, %16, %cst_11 [1] : vector<2x8xf32> to vector<2xf32>
    %18 = vector.shape_cast %17 : vector<2xf32> to vector<2x1xf32>
    %cst_12 = arith.constant 9.99999993E-9 : f32
    %19 = vector.broadcast %cst_12 : f32 to vector<2x1xf32>
    %20 = arith.addf %18, %19 : vector<2x1xf32>
    %cst_13 = arith.constant 1.000000e+00 : f32
    %21 = vector.broadcast %cst_13 : f32 to vector<2x1xf32>
    %22 = arith.divf %21, %20 : vector<2x1xf32>
    %23 = vector.broadcast %22 : vector<2x1xf32> to vector<2x8xf32>
    %24 = arith.mulf %16, %23 : vector<2x8xf32>
    %25 = vector.shape_cast %24 : vector<2x8xf32> to vector<2x8x1xf32>
    %26 = vector.broadcast %25 : vector<2x8x1xf32> to vector<2x8x32xf32>
    %27 = arith.mulf %26, %1 : vector<2x8x32xf32>
    %cst_14 = arith.constant dense<0.000000e+00> : vector<2x32xf32>
    %28 = vector.multi_reduction <add>, %27, %cst_14 [1] : vector<2x8x32xf32> to vector<2x32xf32>
    %c0_15 = arith.constant 0 : index
    %c0_16 = arith.constant 0 : index
    %29 = vector.load %arg6[%c0_15, %c0_16] : memref<2x32xf32, #tpu.memory_space<vmem>>, vector<2x32xf32>
    tpu.vector_store %arg6[%c0_15, %c0_16], %28 {strides = array<i32>} : memref<2x32xf32, #tpu.memory_space<vmem>>, vector<2x32xf32>,
    return
  }
  func.func @transform_0(%arg0: i32) -> (i32, i32) {
    %c0_i32 = arith.constant 0 : i32
    %c0_i32_0 = arith.constant 0 : i32
    return %arg0, %c0_i32 : i32, i32
  }
  func.func @transform_1(%arg0: i32) -> (i32, i32, i32) {
    %c0_i32 = arith.constant 0 : i32
    %c0_i32_0 = arith.constant 0 : i32
    %c0_i32_1 = arith.constant 0 : i32
    return %arg0, %c0_i32, %c0_i32_0 : i32, i32, i32
  }
  func.func @transform_2(%arg0: i32) -> (i32, i32) {
    %c0_i32 = arith.constant 0 : i32
    %c0_i32_0 = arith.constant 0 : i32
    return %arg0, %c0_i32 : i32, i32
  }
  func.func @transform_3(%arg0: i32) -> (i32, i32) {
    %c0_i32 = arith.constant 0 : i32
    %c0_i32_0 = arith.constant 0 : i32
    %c0_i32_1 = arith.constant 0 : i32
    return %c0_i32, %c0_i32_0 : i32, i32
  }
  func.func @transform_4(%arg0: i32) -> (i32, i32) {
    %c0_i32 = arith.constant 0 : i32
    %c0_i32_0 = arith.constant 0 : i32
    %c0_i32_1 = arith.constant 0 : i32
    return %c0_i32, %c0_i32_0 : i32, i32
  }
  func.func @transform_5(%arg0: i32) -> (i32, i32) {
    %c0_i32 = arith.constant 0 : i32
    %c0_i32_0 = arith.constant 0 : i32
    return %arg0, %c0_i32 : i32, i32
  }
}

</mosaic_0001>

<bundles_post_ra>
// kernel: tpu_custom_call.1
= control target key start
LH: loop header
LB: loop body
LE: loop exit
PB: predicated region body
PF: predicated region fallthrough
CT: control target
= control target key end

     0   :  { %10 = vsyncpa [#allocation3], 0  ;;  %s581_s0 = inlined_call_operand.hbm [shape: f32[2,32], index: 0, kind: input, shape index: {}]   ;;  %s582_s1 = inlined_call_operand.hbm [shape: f32[2,8,32], index: 1, kind: input, shape index: {}]   ;;  %s583_s2 = inlined_call_operand.vmem [shape: f32[2,8], index: 2, kind: input, shape index: {}]   ;;  %s584_s3 = inlined_call_operand.hbm [shape: f32[32,32], index: 3, kind: input, shape index: {}]   ;;  %s585_s4 = inlined_call_operand.vmem [shape: f32[1,32], index: 4, kind: input, shape index: {}]   ;;  %s586_s5 = inlined_call_operand.hbm [shape: f32[2,32], index: 5, kind: output, shape index: {}]  }
   0x1   :  { %11 = vsyncpa [#allocation6], 0 }
   0x2   :  { %12 = vsyncpa [#allocation4], 0  ;;  %s455_s18 = smov [#allocation5]   ;;  %s361_s22 = scalar_lea.hbm %s582_s1, 256 }
   0x3   :  { %s28_s19 = sshll.u32 %s455_s18, 4  ;;  %p362_p0 = scmp.ne.s32.totalorder %s582_s1, %s361_s22  ;;  %s29_s19 = int_to_ptr.vmem [resolvable:$true] %s28_s19 }
   0x4   :  { %p365_p1 = scmp.lt.u32.totalorder %s361_s22, %s582_s1 }
   0x6   :  { %p367_p2 = pnand %p365_p1, %p362_p0 }
   0x8   :  { %370 = shalt.err (!%p367_p2)
}
   0x9   :  { %s371_s27 = scalar_lea.vmem %s29_s19, 256  ;;  %p376_p4 = scmp.lt.s32.totalorder %s29_s19, %s29_s19 }
   0xa   :  { %p372_p3 = scmp.ne.s32.totalorder %s29_s19, %s371_s27  ;;  %p377_p5 = scmp.lt.s32.totalorder %s371_s27, %s371_s27 }
   0xc   :  { %p378_p6 = por %p377_p5, %p376_p4 }
   0xe   :  { %p379_p7 = pnand %p378_p6, %p372_p3 }
  0x10   :  { %382 = shalt.err (!%p379_p7)
}
  0x11   :  { %s456_s28 = smov 128   ;;  %s457_s29 = smov 8  }
  0x12   :  { %34 = dma.hbm_to_vmem [thread:$0]  %s582_s1, 256, %s29_s19, [#allocation6], %s456_s28, %s456_s28, %s457_s29  }
  0x13   :  { %s458_s7 = smov [#allocation2]   ;;  %s459_s9 = smov [#allocation7]  }
  0x14   :  { %s19_s8 = sshll.u32 %s458_s7, 4  ;;  %s42_s10 = sshll.u32 %s459_s9, 4  ;;  %s20_s8 = int_to_ptr.vmem [resolvable:$true] %s19_s8  ;;  %s43_s10 = int_to_ptr.vmem [resolvable:$true] %s42_s10 }
  0x15   :  { %s383_s13 = scalar_lea.hbm %s581_s0, 32 }
  0x16   :  { %p384_p8 = scmp.ne.s32.totalorder %s581_s0, %s383_s13  ;;  %p387_p9 = scmp.lt.u32.totalorder %s383_s13, %s581_s0 }
  0x18   :  { %p389_p10 = pnand %p387_p9, %p384_p8 }
  0x1a   :  { %392 = shalt.err (!%p389_p10)
}
  0x1b   :  { %s393_s1 = scalar_lea.vmem %s20_s8, 32  ;;  %p398_p12 = scmp.lt.s32.totalorder %s20_s8, %s20_s8 }
  0x1c   :  { %p394_p11 = scmp.ne.s32.totalorder %s20_s8, %s393_s1  ;;  %p399_p13 = scmp.lt.s32.totalorder %s393_s1, %s393_s1 }
  0x1e   :  { %p400_p0 = por %p399_p13, %p398_p12 }
  0x20   :  { %p401_p1 = pnand %p400_p0, %p394_p11 }
  0x22   :  { %404 = shalt.err (!%p401_p1)
}
  0x23   :  { %22 = dma.hbm_to_vmem [thread:$0]  %s581_s0, 32, %s20_s8, [#allocation3]  }
  0x24   :  { %s405_s22 = scalar_lea.hbm %s584_s3, 512 }
  0x25   :  { %p406_p2 = scmp.ne.s32.totalorder %s584_s3, %s405_s22  ;;  %p409_p3 = scmp.lt.u32.totalorder %s405_s22, %s584_s3 }
  0x27   :  { %p411_p4 = pnand %p409_p3, %p406_p2 }
  0x29   :  { %414 = shalt.err (!%p411_p4)
}
  0x2a   :  { %s415_s27 = scalar_lea.vmem %s43_s10, 512  ;;  %p420_p6 = scmp.lt.s32.totalorder %s43_s10, %s43_s10 }
  0x2b   :  { %p416_p5 = scmp.ne.s32.totalorder %s43_s10, %s415_s27  ;;  %p421_p7 = scmp.lt.s32.totalorder %s415_s27, %s415_s27 }
  0x2d   :  { %p422_p8 = por %p421_p7, %p420_p6 }
  0x2f   :  { %p423_p9 = pnand %p422_p8, %p416_p5 }
  0x31   :  { %426 = shalt.err (!%p423_p9)
}
  0x32   :  { %48 = dma.hbm_to_vmem [thread:$0]  %s584_s3, 512, %s43_s10, [#allocation6], %s456_s28, %s456_s28, %s457_s29  }
  0x33   :  { %449 = dma.done.wait [#allocation3], 32  }
  0x34   :  { %450 = vsyncadd [#allocation3], 4294967264 }
  0x35   :  { %451 = dma.done.wait [#allocation6], 768  }
  0x36   :  { %452 = vsyncadd [#allocation6], 4294966528  ;;  %vm74_vm0 = vcmask 261120   ;;  %v63_v0 = vld [vmem:[#allocation7] sm:$0xff]  ;;  %v64_v1 = vld [vmem:[#allocation7 + $0x8] sm:$0xff]  ;;  %v171_v8 = vlaneseq  ;;  %v461_v36 = vmov 0  }
  0x37   :  { %v65_v2 = vld [vmem:[#allocation7 + $0x10] sm:$0xff]  ;;  %v333_v3 = vpack.c.bf16 %v64_v1, %v63_v0  ;;  %v66_v4 = vld [vmem:[#allocation7 + $0x18] sm:$0xff]  ;;  %v60_v11 = vld [vmem:[%s583_s2] sm:$0x3]  ;;  %v460_v15 = vmov 1966171168   ;;  %349 = vset.pattern.permute.xlu0 %v461_v36  ;;  %350 = vset.pattern.permute.xlu1 %v461_v36 }
  0x38   :  { %v535_v5 = vld [vmem:[#allocation5] sm:$0xff]  ;;  %v337_v6 = vpack.c.bf16 %v66_v4, %v65_v2  ;;  %v539_v7 = vld [vmem:[#allocation5 + $0x8] sm:$0xff]  ;;  %v543_v9 = vshrl.u32 %v171_v8, 7  ;;  %v169_v16 = vunpack.c.l.s4 %v460_v15  ;;  %v312_v17 = vld [vmem:[%s585_s4] ss:$0 sm:$0xff]  ;;  %v232_v47 = vand.u32 127, %v171_v8 }
  0x39   :  { %330 = vmatprep.mubr.msk.f32.mxu0 %vm74_vm0, %v535_v5  ;;  %334 = vmatprep.subr.bf16.mxu0 %v333_v3  ;;  %v315_v23 = vld.sshfl [vmem:[#allocation2] sm:$0x11 pattern:$0x75316420]  ;;  %vm241_vm1 = vcmask 1041409   ;;  %vm244_vm2 = vcmask 58368  }
  0x3a   :  { %336 = vmatpush3.bf16.msra.mxu0 %v333_v3  ;;  %v546_v10 = vsub.s32 0, %v543_v9  ;;  %v214_v12 = vsub.s32 1, %v543_v9  ;;  %v170_v18 = vunpack.c.0.s8 %v169_v16  ;;  %v167_v25 = vcombine.high %v315_v23, %v315_v23  ;;  %s462_s2 = smov [#allocation8]  }
  0x3b   :  { %338 = vmatprep.subr.bf16.mxu0 %v337_v6  ;;  %v235_v48 = vsub.s32 %v232_v47, %v543_v9  ;;  %s302_s4 = sshll.u32 %s462_s2, 4  ;;  %vm294_vm3 = vcmask 254976   ;;  %s303_s4 = int_to_ptr.vmem [resolvable:$true] %s302_s4 }
  0x3c   :  { %v208_v13 = vrot.slane %v60_v11, %v546_v10  ;;  %v215_v14 = vrot.slane %v60_v11, %v214_v12  ;;  %v173_v24 = vsub.s32 %v170_v18, %v543_v9  ;;  %s427_s7 = scalar_lea.vmem %s303_s4, 32  ;;  %p432_p11 = scmp.lt.s32.totalorder %s303_s4, %s303_s4 }
  0x3d   :  { %p428_p10 = scmp.ne.s32.totalorder %s303_s4, %s427_s7  ;;  %p433_p12 = scmp.lt.s32.totalorder %s427_s7, %s427_s7 }
  0x3e   :  { %340 = vmatpush3.bf16.msra.mxu0 %v337_v6  ;;  %210 = vbcast.lane.b32.xlu1 %v208_v13, 256  ;;  %v174_v26 = vrot.slane %v315_v23, %v173_v24  ;;  %v181_v27 = vrot.slane %v167_v25, %v173_v24 }
  0x3f   :  { %p434_p13 = por %p433_p12, %p432_p11 }
  0x40   :  { %v185_v28 = vrot.slane %v174_v26, %v546_v10  ;;  %v189_v30 = vrot.slane %v181_v27, %v546_v10 }
  0x41   :  { %331 = vmatmul.mubr.msk.f32.vlgmr.msra.gmra.mrb[0].mxu0 %vm74_vm0, %v539_v7  ;;  %p435_p0 = pnand %p434_p13, %p428_p10 }
  0x42   :  { %217 = vbcast.lane.b32.xlu1 %v215_v14, 256 }
  0xb0   :  { %v211_v41 = vpop.permute.xlu1 %210 }
  0xb4   :  { %v218_v44 = vpop.permute.xlu1 %217 }
 0x114   :  { %v332_v19 = vpop.f32.mrb[0].mxu0 }
 0x115   :  { %v153_v20 = vadd.f32 %v332_v19, %v312_v17  ;;  %v147_v21 = vpop.f32.mrb[1].mxu0 }
 0x116   :  { %v148_v22 = vadd.f32 %v312_v17, %v147_v21 }
 0x117   :  { %351 = vtanh.f32 %v153_v20 }
 0x118   :  { %353 = vtanh.f32 %v148_v22 }
 0x121   :  { %v352_v29 = vpop.eup %351 }
 0x122   :  { %v354_v31 = vpop.eup %353  ;;  %v193_v34 = vmul.f32 %v352_v29, %v189_v30 }
 0x123   :  { %v192_v32 = vmul.f32 %v354_v31, %v185_v28 }
 0x124   :  { %v197_v35 = vsel %vm74_vm0, %v193_v34, 0.0 }
 0x125   :  { %v194_v33 = vsel %vm74_vm0, %v192_v32, 0.0 }
 0x126   :  { %195 = vadd.xlane.f32.xlu0 %v194_v33 }
 0x12a   :  { %198 = vadd.xlane.f32.xlu0 %v197_v35 }
 0x1b3   :  { %v196_v37 = vpop.xlane.xlu0 %195 }
 0x1b4   :  { %v200_v38 = vmul.f32 1.442695, %v196_v37 }
 0x1b6   :  { %355 = vpow2.f32 %v200_v38 }
 0x1b7   :  { %v199_v39 = vpop.xlane.xlu0 %198 }
 0x1b8   :  { %v202_v40 = vmul.f32 1.442695, %v199_v39 }
 0x1ba   :  { %357 = vpow2.f32 %v202_v40 }
 0x1c0   :  { %v356_v42 = vpop.eup %355 }
 0x1c1   :  { %v221_v43 = vmul.f32 %v356_v42, %v211_v41 }
 0x1c3   :  { %226 = vperm.xlu0 %349, %v221_v43  }
 0x1c4   :  { %v358_v45 = vpop.eup %357 }
 0x1c5   :  { %v222_v46 = vmul.f32 %v358_v45, %v218_v44 }
 0x1c7   :  { %229 = vperm.xlu1 %350, %v222_v46  }
 0x242   :  { %v227_v49 = vpop.permute.xlu0 %226 }
 0x243   :  { %v236_v51 = vrot.slane %v227_v49, %v235_v48 }
 0x246   :  { %v230_v50 = vpop.permute.xlu1 %229 }
 0x247   :  { %v240_v52 = vrot.slane %v230_v50, %v235_v48 }
 0x249   :  { %v242_v53 = vsel %vm241_vm1, %v240_v52, %v236_v51 }
 0x24a   :  { %v245_v54 = vsel %vm244_vm2, %v242_v53, 0.0 }
 0x24b   :  { %246 = vadd.xlane.f32.xlu1 %v245_v54 }
 0x2d8   :  { %v247_v55 = vpop.xlane.xlu1 %246 }
 0x2d9   :  { %v248_v56 = vadd.f32 1e-08, %v247_v55 }
 0x2db   :  { %359 = vrcp.f32 %v248_v56 }
 0x2e5   :  { %v360_v57 = vpop.eup %359 }
 0x2e6   :  { %v259_v58 = vrot.slane %v360_v57, %v214_v12  ;;  %v255_v59 = vrot.slane %v360_v57, %v546_v10 }
 0x2e8   :  { %v263_v60 = vmul.f32 %v259_v58, %v222_v46  ;;  %v262_v61 = vmul.f32 %v255_v59, %v221_v43 }
 0x2ea   :  { %271 = vperm.xlu0 %349, %v263_v60   ;;  %266 = vperm.xlu1 %350, %v262_v61  }
 0x369   :  { %v272_v62 = vpop.permute.xlu0 %271  ;;  %v267_v63 = vpop.permute.xlu1 %266 }
 0x36a   :  { %v275_v0 = vmul.f32 %v272_v62, %v539_v7  ;;  %v274_v1 = vmul.f32 %v267_v63, %v535_v5 }
 0x36c   :  { %v283_v2 = vsel %vm74_vm0, %v275_v0, 0.0  ;;  %v276_v3 = vsel %vm74_vm0, %v274_v1, 0.0 }
 0x36d   :  { %v284_v4 = vrot.slane %v283_v2, 4  ;;  %v277_v6 = vrot.slane %v276_v3, 4 }
 0x36f   :  { %v285_v8 = vadd.f32 %v284_v4, %v283_v2  ;;  %v278_v9 = vadd.f32 %v277_v6, %v276_v3 }
 0x371   :  { %v286_v11 = vrot.slane %v285_v8, 2  ;;  %v279_v10 = vrot.slane %v278_v9, 2 }
 0x373   :  { %v287_v12 = vadd.f32 %v286_v11, %v285_v8  ;;  %v280_v13 = vadd.f32 %v279_v10, %v278_v9 }
 0x375   :  { %v288_v14 = vrot.slane %v287_v12, 1  ;;  %v281_v15 = vrot.slane %v280_v13, 1 }
 0x377   :  { %v289_v16 = vadd.f32 %v288_v14, %v287_v12  ;;  %v282_v7 = vadd.f32 %v281_v15, %v280_v13 }
 0x379   :  { %v292_v5 = vsel %vm241_vm1, %v289_v16, %v282_v7 }
 0x37a   :  { %295 = vst.msk [vmem:[#allocation8] sm:$0x3] %vm294_vm3, %v292_v5 }
 0x37b   :  { %438 = shalt.err (!%p435_p0)
}
 0x37c   :  { %s439_s10 = scalar_lea.hbm %s586_s5, 32 }
 0x37d   :  { %p440_p1 = scmp.ne.s32.totalorder %s586_s5, %s439_s10  ;;  %p443_p2 = scmp.lt.u32.totalorder %s439_s10, %s586_s5 }
 0x37f   :  { %p445_p3 = pnand %p443_p2, %p440_p1 }
 0x381   :  { %448 = shalt.err (!%p445_p3)
}
 0x382   :  { %305 = dma.vmem_to_hbm [thread:$0]  %s303_s4, 32, %s586_s5, [#allocation4]  }
 0x383   :  { %453 = dma.done.wait [#allocation4], 32  }
 0x384   :  { %454 = vsyncadd [#allocation4], 4294967264 }
 0x385   :  { %309 = vsyncpa [#allocation3], 1 }
 0x386   :  { %310 = vsyncpa [#allocation6], 1 }
 0x387   :  { %311 = vsyncpa [#allocation4], 1 }

</bundles_post_ra>
